<compile_context>
chip_gen: v7x
topology: tpu7x:2x2x1
jax: 0.10.0
libtpu: 0.0.40
codegen_flags: <defaults>
</compile_context>

<pallas_src>
import jax
import jax.numpy as jnp
from jax import lax
from jax.experimental import pallas as pl
from jax.experimental.pallas import tpu as pltpu

IN_FEAT = 48            # in_feat
OUT_FEAT = 8            # out_feat == k_dims (fc is Linear(8, 48))
FC_OUT = 48
QKV = 3 * OUT_FEAT      # fused q/k/v projection width = 24
TB_MAX = 2048           # max batch tile (rows); ~5 MiB/step footprint at 2048


def ultimus_kernel(x_ref, wqkv_ref, bqkv_ref, wfT_ref, bf_ref, o_ref):
    x = x_ref[...].astype(jnp.float32)                               # (TB, 48)

    # Fused q/k/v projection.  Contracting the 48-feature axis of both
    # operands flips the batch tile onto lanes: (24,48).(TB,48) -> (24,TB).
    qkv = lax.dot_general(
        wqkv_ref[...], x, (((1,), (1,)), ((), ())),
        preferred_element_type=jnp.float32) + bqkv_ref[...]          # (24, TB)

    q = qkv[0 * OUT_FEAT:1 * OUT_FEAT, :]                            # (8, TB)
    k = qkv[1 * OUT_FEAT:2 * OUT_FEAT, :]   # (8, TB), pre-scaled by 1/sqrt(8)
    v = qkv[2 * OUT_FEAT:3 * OUT_FEAT, :]                            # (8, TB)

    # s[i, j, b] = q[b, i] * k_scaled[b, j]   (scale folded into wqkv/bqkv)
    s = q[:, None, :] * k[None, :, :]                                # (8, 8, TB)
    # Numerically stable softmax over the i axis (PyTorch dim=1), with the
    # normalization fused into the weighted v-sum (no explicit `am` tensor).
    s = s - jnp.max(s, axis=0, keepdims=True)
    e = jnp.exp(s)                                                   # (8, 8, TB)
    denom = jnp.sum(e, axis=0)                                       # (8, TB)
    z = jnp.sum(v[:, None, :] * e, axis=0) / denom                   # (8, TB)

    # Final Linear(8, 48).  Contracting the 8-axis of both operands flips the
    # batch tile back onto sublanes: (8,TB).(8,48) -> (TB,48), matching the
    # (TB, 48) output block directly (no wrapper-side transpose needed).
    out = lax.dot_general(
        z, wfT_ref[...], (((0,), (0,)), ((), ())),
        preferred_element_type=jnp.float32) + bf_ref[...]            # (TB, 48)
    o_ref[...] = out.astype(o_ref.dtype)


def _round_up(a, m):
    return ((a + m - 1) // m) * m


def _choose_tb(B):
    # Multiple of 128, capped at TB_MAX.  For large B aim for >= 4 grid steps
    # so v7x's two TensorCores each get >= 2 steps of DMA/compute overlap
    # after the "parallel" batch axis is split across them.
    quarter = _round_up(max(1, pl.cdiv(B, 4)), 128)
    return int(max(128, min(TB_MAX, quarter)))


def ultimus_block(x, params):
    """x: (B, IN_FEAT) -> (B, 1, FC_OUT), matching UltimusBlock.forward."""
    wqkv, bqkv, wfT, bf = params
    B = x.shape[0]
    tb = _choose_tb(B)
    Bp = _round_up(B, tb)
    # Only a row pad (no transpose); skipped entirely when B divides evenly.
    xp = x if Bp == B else jnp.pad(x, ((0, Bp - B), (0, 0)))

    def const2d(shape):
        return pl.BlockSpec(shape, lambda i: (0, 0))

    out = pl.pallas_call(
        ultimus_kernel,
        out_shape=jax.ShapeDtypeStruct((Bp, FC_OUT), x.dtype),
        grid=(Bp // tb,),
        in_specs=[
            pl.BlockSpec((tb, IN_FEAT), lambda i: (i, 0)),    # x row tile
            const2d((QKV, IN_FEAT)),                          # fused QKV W (24,48)
            const2d((QKV, 1)),                                # fused QKV b (24,1)
            const2d((OUT_FEAT, FC_OUT)),                      # fc W^T      (8,48)
            const2d((1, FC_OUT)),                             # fc b        (1,48)
        ],
        out_specs=pl.BlockSpec((tb, FC_OUT), lambda i: (i, 0)),
        compiler_params=pltpu.CompilerParams(
            dimension_semantics=("parallel",),
            vmem_limit_bytes=32 * 1024 * 1024),
    )(xp, wqkv, bqkv, wfT, bf)

    return out[:B].reshape(B, 1, FC_OUT)


def init_params(key):
    """PyTorch-Linear-style init: U(-1/sqrt(fan_in), 1/sqrt(fan_in)).

    Returns PyTorch-layout params (out_features, in_features) for the four
    Linear layers, exactly mirroring the nn.Module."""
    def linear(k, fan_in, fan_out):
        kw, kb = jax.random.split(k)
        bound = 1.0 / (fan_in ** 0.5)
        w = jax.random.uniform(kw, (fan_out, fan_in), jnp.float32, -bound, bound)
        b = jax.random.uniform(kb, (fan_out,), jnp.float32, -bound, bound)
        return w, b

    kq, kk, kv, kf = jax.random.split(key, 4)
    return {
        "q": linear(kq, IN_FEAT, OUT_FEAT),
        "k": linear(kk, IN_FEAT, OUT_FEAT),
        "v": linear(kv, IN_FEAT, OUT_FEAT),
        "fc": linear(kf, OUT_FEAT, FC_OUT),
    }


def fuse_params(p):
    """Fuse q/k/v into one (24,48) projection, fold 1/sqrt(k_dims) into the k
    rows, and pre-transpose the fc weight for the in-kernel dot_general."""
    scale = 1.0 / (OUT_FEAT ** 0.5)
    (wq, bq), (wk, bk), (wv, bv), (wf, bf) = p["q"], p["k"], p["v"], p["fc"]
    wqkv = jnp.concatenate([wq, wk * scale, wv], axis=0)              # (24, 48)
    bqkv = jnp.concatenate([bq, bk * scale, bv], axis=0)[:, None]     # (24, 1)
    return wqkv, bqkv, wf.T, bf[None, :]                              # (8,48),(1,48)


def ref_forward(x, p):
    """Pure-JAX reference mirroring the PyTorch forward exactly."""
    (wq, bq), (wk, bk), (wv, bv), (wf, bf) = p["q"], p["k"], p["v"], p["fc"]
    k = (x @ wk.T + bk)[:, None, :]                                   # (B,1,8)
    q = (x @ wq.T + bq)[:, None, :]
    v = (x @ wv.T + bv)[:, None, :]
    s = jnp.swapaxes(q, 1, 2) @ k / (OUT_FEAT ** 0.5)                 # (B,8,8)
    am = jax.nn.softmax(s, axis=1)                                    # dim=1
    z = v @ am                                                        # (B,1,8)
    return z @ wf.T + bf                                              # (B,1,48)


if __name__ == "__main__":
    key = jax.random.PRNGKey(0)
    kx, kp = jax.random.split(key)
    x = jax.random.normal(kx, (2, IN_FEAT), dtype=jnp.float32)        # (B=2, 48)
    torch_params = init_params(kp)
    kernel_params = fuse_params(torch_params)

    out = ultimus_block(x, kernel_params)
    out = jax.block_until_ready(out)

    ref = ref_forward(x, torch_params)
    assert out.shape == (2, 1, FC_OUT)
    assert jnp.allclose(out, ref, atol=1e-4, rtol=1e-4), \
        float(jnp.max(jnp.abs(out - ref)))

    print("KERNEL_OK")
</pallas_src>

<mosaic_0001>
module attributes {stable_mosaic.version = 11 : i64} {
  func.func @ultimus_kernel(%arg0: i32, %arg1: memref<128x48xf32, #tpu.memory_space<vmem>>, %arg2: memref<24x48xf32, #tpu.memory_space<vmem>>, %arg3: memref<24x1xf32, #tpu.memory_space<vmem>>, %arg4: memref<8x48xf32, #tpu.memory_space<vmem>>, %arg5: memref<1x48xf32, #tpu.memory_space<vmem>>, %arg6: memref<128x48xf32, #tpu.memory_space<vmem>>) attributes {dimension_semantics = [#tpu.dimension_semantics<parallel>], iteration_bounds = array<i64: 1>, scalar_prefetch = 0 : i64, scratch_operands = 0 : i64, tpu.core_type = #tpu.core_type<tc>, window_params = [{transform_indices = @transform_0, window_bounds = array<i64: 128, 48>}, {pipeline_mode = #tpu.pipeline_mode<synchronous>, transform_indices = @transform_1, window_bounds = array<i64: 24, 48>}, {pipeline_mode = #tpu.pipeline_mode<synchronous>, transform_indices = @transform_2, window_bounds = array<i64: 24, 1>}, {pipeline_mode = #tpu.pipeline_mode<synchronous>, transform_indices = @transform_3, window_bounds = array<i64: 8, 48>}, {pipeline_mode = #tpu.pipeline_mode<synchronous>, transform_indices = @transform_4, window_bounds = array<i64: 1, 48>}, {transform_indices = @transform_5, window_bounds = array<i64: 128, 48>}]} {
    %c0 = arith.constant 0 : index
    %c0_0 = arith.constant 0 : index
    %0 = vector.load %arg1[%c0, %c0_0] : memref<128x48xf32, #tpu.memory_space<vmem>>, vector<128x48xf32>
    %c0_1 = arith.constant 0 : index
    %c0_2 = arith.constant 0 : index
    %1 = vector.load %arg2[%c0_1, %c0_2] : memref<24x48xf32, #tpu.memory_space<vmem>>, vector<24x48xf32>
    %cst = arith.constant dense<0.000000e+00> : vector<24x128xf32>
    %2 = tpu.matmul %1, %0, %cst {dimension_numbers = #tpu.dot_dimension_numbers<[1], [1], [0], [0], [0, 0, 1, 0], [], []>} : vector<24x48xf32>, vector<128x48xf32>, vector<24x128xf32> -> vector<24x128xf32>
    %c0_3 = arith.constant 0 : index
    %c0_4 = arith.constant 0 : index
    %3 = vector.load %arg3[%c0_3, %c0_4] : memref<24x1xf32, #tpu.memory_space<vmem>>, vector<24x1xf32>
    %4 = vector.broadcast %3 : vector<24x1xf32> to vector<24x128xf32>
    %5 = arith.addf %2, %4 : vector<24x128xf32>
    %6 = vector.extract_strided_slice %5 {offsets = [0, 0], sizes = [8, 128], strides = [1, 1]} : vector<24x128xf32> to vector<8x128xf32>
    %7 = vector.extract_strided_slice %5 {offsets = [8, 0], sizes = [8, 128], strides = [1, 1]} : vector<24x128xf32> to vector<8x128xf32>
    %8 = vector.extract_strided_slice %5 {offsets = [16, 0], sizes = [8, 128], strides = [1, 1]} : vector<24x128xf32> to vector<8x128xf32>
    %9 = vector.shape_cast %6 : vector<8x128xf32> to vector<8x1x128xf32>
    %10 = vector.shape_cast %7 : vector<8x128xf32> to vector<1x8x128xf32>
    %11 = vector.broadcast %9 : vector<8x1x128xf32> to vector<8x8x128xf32>
    %12 = vector.broadcast %10 : vector<1x8x128xf32> to vector<8x8x128xf32>
    %13 = arith.mulf %11, %12 : vector<8x8x128xf32>
    %cst_5 = arith.constant dense<0xFF800000> : vector<8x128xf32>
    %14 = vector.multi_reduction <maximumf>, %13, %cst_5 [0] : vector<8x8x128xf32> to vector<8x128xf32>
    %15 = vector.shape_cast %14 : vector<8x128xf32> to vector<1x8x128xf32>
    %16 = vector.broadcast %15 : vector<1x8x128xf32> to vector<8x8x128xf32>
    %17 = arith.subf %13, %16 : vector<8x8x128xf32>
    %18 = math.exp %17 : vector<8x8x128xf32>
    %cst_6 = arith.constant dense<0.000000e+00> : vector<8x128xf32>
    %19 = vector.multi_reduction <add>, %18, %cst_6 [0] : vector<8x8x128xf32> to vector<8x128xf32>
    %20 = vector.shape_cast %8 : vector<8x128xf32> to vector<8x1x128xf32>
    %21 = vector.broadcast %20 : vector<8x1x128xf32> to vector<8x8x128xf32>
    %22 = arith.mulf %21, %18 : vector<8x8x128xf32>
    %cst_7 = arith.constant dense<0.000000e+00> : vector<8x128xf32>
    %23 = vector.multi_reduction <add>, %22, %cst_7 [0] : vector<8x8x128xf32> to vector<8x128xf32>
    %24 = arith.divf %23, %19 : vector<8x128xf32>
    %c0_8 = arith.constant 0 : index
    %c0_9 = arith.constant 0 : index
    %25 = vector.load %arg4[%c0_8, %c0_9] : memref<8x48xf32, #tpu.memory_space<vmem>>, vector<8x48xf32>
    %cst_10 = arith.constant dense<0.000000e+00> : vector<128x48xf32>
    %26 = tpu.matmul %24, %25, %cst_10 {dimension_numbers = #tpu.dot_dimension_numbers<[0], [0], [1], [1], [0, 1, 1, 1], [], []>} : vector<8x128xf32>, vector<8x48xf32>, vector<128x48xf32> -> vector<128x48xf32>
    %c0_11 = arith.constant 0 : index
    %c0_12 = arith.constant 0 : index
    %27 = vector.load %arg5[%c0_11, %c0_12] : memref<1x48xf32, #tpu.memory_space<vmem>>, vector<1x48xf32>
    %28 = vector.broadcast %27 : vector<1x48xf32> to vector<128x48xf32>
    %29 = arith.addf %26, %28 : vector<128x48xf32>
    %c0_13 = arith.constant 0 : index
    %c0_14 = arith.constant 0 : index
    %30 = vector.load %arg6[%c0_13, %c0_14] : memref<128x48xf32, #tpu.memory_space<vmem>>, vector<128x48xf32>
    tpu.vector_store %arg6[%c0_13, %c0_14], %29 {strides = array<i32>} : memref<128x48xf32, #tpu.memory_space<vmem>>, vector<128x48xf32>,
    return
  }
  func.func @transform_0(%arg0: i32) -> (i32, i32) {
    %c0_i32 = arith.constant 0 : i32
    %c0_i32_0 = arith.constant 0 : i32
    return %arg0, %c0_i32 : i32, i32
  }
  func.func @transform_1(%arg0: i32) -> (i32, i32) {
    %c0_i32 = arith.constant 0 : i32
    %c0_i32_0 = arith.constant 0 : i32
    %c0_i32_1 = arith.constant 0 : i32
    return %c0_i32, %c0_i32_0 : i32, i32
  }
  func.func @transform_2(%arg0: i32) -> (i32, i32) {
    %c0_i32 = arith.constant 0 : i32
    %c0_i32_0 = arith.constant 0 : i32
    %c0_i32_1 = arith.constant 0 : i32
    return %c0_i32, %c0_i32_0 : i32, i32
  }
  func.func @transform_3(%arg0: i32) -> (i32, i32) {
    %c0_i32 = arith.constant 0 : i32
    %c0_i32_0 = arith.constant 0 : i32
    %c0_i32_1 = arith.constant 0 : i32
    return %c0_i32, %c0_i32_0 : i32, i32
  }
  func.func @transform_4(%arg0: i32) -> (i32, i32) {
    %c0_i32 = arith.constant 0 : i32
    %c0_i32_0 = arith.constant 0 : i32
    %c0_i32_1 = arith.constant 0 : i32
    return %c0_i32, %c0_i32_0 : i32, i32
  }
  func.func @transform_5(%arg0: i32) -> (i32, i32) {
    %c0_i32 = arith.constant 0 : i32
    %c0_i32_0 = arith.constant 0 : i32
    return %arg0, %c0_i32 : i32, i32
  }
}

</mosaic_0001>

<bundles_post_ra>
// kernel: tpu_custom_call.1
= control target key start
LH: loop header
LB: loop body
LE: loop exit
PB: predicated region body
PF: predicated region fallthrough
CT: control target
= control target key end

     0   :  { %vm57_vm0 = vcmask 392192   ;;  %v888_v0 = vmov 0.0|0.0   ;;  %vm889_vm2 = vmmov 0   ;;  %v890_v4 = vmov 0.0   ;;  %s1135_s0 = inlined_call_operand.vmem [shape: f32[128,48], index: 0, kind: input, shape index: {}]   ;;  %s1136_s2 = inlined_call_operand.vmem [shape: f32[24,1], index: 2, kind: input, shape index: {}]   ;;  %s1137_s1 = inlined_call_operand.vmem [shape: f32[24,48], index: 1, kind: input, shape index: {}]   ;;  %s1138_s3 = inlined_call_operand.vmem [shape: f32[8,48], index: 3, kind: input, shape index: {}]   ;;  %s1139_s4 = inlined_call_operand.vmem [shape: f32[1,48], index: 4, kind: input, shape index: {}]   ;;  %s1140_s5 = inlined_call_operand.vmem [shape: f32[128,48], index: 5, kind: output, shape index: {}]  }
   0x1   :  { %831 = vmatprep.subr.bf16.mxu0 %v888_v0  ;;  %v20_v1 = vld [vmem:[%s1135_s0] sm:$0xff]  ;;  %v21_v2 = vld [vmem:[%s1135_s0 + $0x8] sm:$0xff]  ;;  %vm931_vm1 = vmpackc.low %vm57_vm0, %vm57_vm0  ;;  %796 = vmatprep.mubr.msk.f32.mxu0 %vm889_vm2, %v890_v4  ;;  %v891_v6 = vmov 0   ;;  %v892_v34 = vmov 1966171168   ;;  %v200_v36 = vlaneseq  ;;  %vm478_vm3 = vcmask 64512  }
   0x2   :  { %v832_v5 = vpack.c.bf16 %v21_v2, %v20_v1  ;;  %868 = vset.pattern.permute.xlu0 %v891_v6  ;;  %869 = vset.pattern.permute.xlu1 %v891_v6  ;;  %v22_v7 = vld [vmem:[%s1135_s0 + $0x10] sm:$0xff]  ;;  %v23_v8 = vld [vmem:[%s1135_s0 + $0x18] sm:$0xff]  ;;  %v39_v9 = vld [vmem:[%s1136_s2] sm:$0xff]  ;;  %v198_v35 = vunpack.c.l.s4 %v892_v34 }
   0x3   :  { %v836_v10 = vpack.c.bf16 %v23_v8, %v22_v7  ;;  %44 = vperm.xlu0 %868, %v39_v9   ;;  %v41_v11 = vld [vmem:[%s1136_s2 + $0x10] sm:$0xff]  ;;  %v40_v12 = vld [vmem:[%s1136_s2 + $0x8] sm:$0xff]  ;;  %v24_v13 = vld [vmem:[%s1135_s0 + $0x20] sm:$0xff]  ;;  %v201_v38 = vshrl.u32 %v200_v36, 7 }
   0x4   :  { %834 = vmatpush3.bf16.xpose.msk.msra.mxu0 %vm931_vm1, %v832_v5  ;;  %54 = vperm.xlu1 %869, %v41_v11   ;;  %v25_v14 = vld [vmem:[%s1135_s0 + $0x28] sm:$0xff]  ;;  %v26_v16 = vld [vmem:[%s1135_s0 + $0x30] sm:$0xff]  ;;  %v27_v17 = vld [vmem:[%s1135_s0 + $0x38] sm:$0xff]  ;;  %v199_v37 = vunpack.c.0.s8 %v198_v35 }
   0x5   :  { %835 = vmatprep.subr.bf16.mxu0 %v888_v0  ;;  %v840_v15 = vpack.c.bf16 %v25_v14, %v24_v13  ;;  %v844_v18 = vpack.c.bf16 %v27_v17, %v26_v16  ;;  %v28_v19 = vld [vmem:[%s1135_s0 + $0x40] sm:$0xff]  ;;  %v29_v20 = vld [vmem:[%s1135_s0 + $0x48] sm:$0xff]  ;;  %v30_v22 = vld [vmem:[%s1135_s0 + $0x50] sm:$0xff]  ;;  %v1020_v46 = vsub.s32 0, %v201_v38 }
   0x6   :  { %v848_v21 = vpack.c.bf16 %v29_v20, %v28_v19  ;;  %v31_v23 = vld [vmem:[%s1135_s0 + $0x58] sm:$0xff]  ;;  %v32_v25 = vld [vmem:[%s1135_s0 + $0x60] sm:$0xff]  ;;  %v33_v26 = vld [vmem:[%s1135_s0 + $0x68] sm:$0xff]  ;;  %v1017_v39 = vsub.s32 %v199_v37, %v201_v38 }
   0x7   :  { %49 = vperm.xlu0 %868, %v40_v12   ;;  %v852_v24 = vpack.c.bf16 %v31_v23, %v30_v22  ;;  %v856_v27 = vpack.c.bf16 %v33_v26, %v32_v25  ;;  %v34_v28 = vld [vmem:[%s1135_s0 + $0x70] sm:$0xff]  ;;  %v35_v29 = vld [vmem:[%s1135_s0 + $0x78] sm:$0xff]  ;;  %v36_v31 = vld [vmem:[%s1137_s1] sm:$0xff] }
   0x8   :  { %v860_v30 = vpack.c.bf16 %v35_v29, %v34_v28  ;;  %v37_v32 = vld [vmem:[%s1137_s1 + $0x8] sm:$0xff]  ;;  %v38_v33 = vld [vmem:[%s1137_s1 + $0x10] sm:$0xff] }
   0xc   :  { %838 = vmatpush3.bf16.xpose.msk.msra.mxu0 %vm931_vm1, %v836_v10 }
   0xd   :  { %839 = vmatprep.subr.bf16.mxu0 %v888_v0 }
  0x14   :  { %842 = vmatpush3.bf16.xpose.msk.msra.mxu0 %vm931_vm1, %v840_v15 }
  0x15   :  { %843 = vmatprep.subr.bf16.mxu0 %v888_v0 }
  0x1c   :  { %846 = vmatpush3.bf16.xpose.msk.msra.mxu0 %vm931_vm1, %v844_v18 }
  0x1d   :  { %847 = vmatprep.subr.bf16.mxu0 %v888_v0 }
  0x24   :  { %850 = vmatpush3.bf16.xpose.msk.msra.mxu0 %vm931_vm1, %v848_v21 }
  0x25   :  { %851 = vmatprep.subr.bf16.mxu0 %v888_v0 }
  0x2c   :  { %854 = vmatpush3.bf16.xpose.msk.msra.mxu0 %vm931_vm1, %v852_v24 }
  0x2d   :  { %855 = vmatprep.subr.bf16.mxu0 %v888_v0 }
  0x34   :  { %858 = vmatpush3.bf16.xpose.msk.msra.mxu0 %vm931_vm1, %v856_v27 }
  0x35   :  { %859 = vmatprep.subr.bf16.mxu0 %v888_v0 }
  0x3c   :  { %862 = vmatpush3.bf16.xpose.msk.msra.mxu0 %vm931_vm1, %v860_v30 }
  0x43   :  { %797 = vmatmul.mubr.msk.f32.vlgmr.msra.gmra.mrb[0].mxu0 %vm57_vm0, %v36_v31 }
  0x44   :  { %799 = vmatprep.mubr.msk.f32.mxu0 %vm889_vm2, %v890_v4 }
  0x47   :  { %800 = vmatmul.mubr.msk.f32.gmra.mrb[2].mxu0 %vm57_vm0, %v37_v32 }
  0x48   :  { %802 = vmatprep.mubr.msk.f32.mxu0 %vm889_vm2, %v890_v4 }
  0x4b   :  { %803 = vmatmul.mubr.msk.f32.gmra.mrb[4].mxu0 %vm57_vm0, %v38_v33 }
  0x82   :  { %v45_v40 = vpop.permute.xlu0 %44 }
  0x83   :  { %v55_v8 = vpop.permute.xlu1 %54 }
  0x86   :  { %v50_v52 = vpop.permute.xlu0 %49 }
 0x116   :  { %v181_v41 = vpop.f32.mrb[0].mxu0 }
 0x117   :  { %v182_v42 = vadd.f32 %v181_v41, %v45_v40  ;;  %v798_v43 = vpop.f32.mrb[1].mxu0 }
 0x119   :  { %v196_v44 = vcombine.high %v182_v42, %v182_v42  ;;  %v203_v45 = vrot.slane %v182_v42, %v1017_v39 }
 0x11a   :  { %v186_v47 = vpop.f32.mrb[2].mxu0 }
 0x11b   :  { %v210_v48 = vrot.slane %v196_v44, %v1017_v39  ;;  %v211_v49 = vcombine.high %v203_v45, %v203_v45  ;;  %v219_v50 = vrot.slane %v203_v45, %v1017_v39  ;;  %v801_v51 = vpop.f32.mrb[3].mxu0  ;;  %v187_v58 = vadd.f32 %v186_v47, %v50_v52 }
 0x11d   :  { %v212_v53 = vcombine.high %v210_v48, %v210_v48  ;;  %v226_v54 = vrot.slane %v210_v48, %v1017_v39  ;;  %v233_v55 = vrot.slane %v211_v49, %v1017_v39  ;;  %v241_v56 = vcombine.high %v219_v50, %v219_v50 }
 0x11e   :  { %v248_v57 = vrot.slane %v219_v50, %v1020_v46  ;;  %v191_v59 = vpop.f32.mrb[4].mxu0 }
 0x11f   :  { %v240_v60 = vrot.slane %v212_v53, %v1017_v39  ;;  %v242_v61 = vcombine.high %v226_v54, %v226_v54  ;;  %v243_v62 = vcombine.high %v233_v55, %v233_v55  ;;  %v252_v63 = vrot.slane %v233_v55, %v1020_v46  ;;  %v804_v0 = vpop.f32.mrb[5].mxu0 }
 0x120   :  { %v256_v1 = vrot.slane %v241_v56, %v1020_v46  ;;  %v264_v2 = vrot.slane %v226_v54, %v1020_v46  ;;  %v285_v3 = vmul.f32 %v248_v57, %v187_v58  ;;  %v192_v16 = vadd.f32 %v191_v59, %v55_v8 }
 0x121   :  { %v244_v4 = vcombine.high %v240_v60, %v240_v60  ;;  %v260_v5 = vrot.slane %v243_v62, %v1020_v46  ;;  %v268_v6 = vrot.slane %v240_v60, %v1020_v46  ;;  %v272_v7 = vrot.slane %v242_v61, %v1020_v46 }
 0x122   :  { %v286_v9 = vmul.f32 %v252_v63, %v187_v58  ;;  %v287_v10 = vmul.f32 %v256_v1, %v187_v58  ;;  %v289_v11 = vmul.f32 %v264_v2, %v187_v58  ;;  %v332_v23 = vcombine.high %v192_v16, %v192_v16 }
 0x123   :  { %v276_v12 = vrot.slane %v244_v4, %v1020_v46  ;;  %v290_v13 = vmul.f32 %v268_v6, %v187_v58  ;;  %v291_v14 = vmul.f32 %v272_v7, %v187_v58  ;;  %v288_v15 = vmul.f32 %v260_v5, %v187_v58 }
 0x124   :  { %v293_v17 = vmax.f32 %v285_v3, %v289_v11  ;;  %v339_v26 = vrot.slane %v192_v16, %v1017_v39  ;;  %v346_v27 = vrot.slane %v332_v23, %v1017_v39 }
 0x125   :  { %v292_v18 = vmul.f32 %v276_v12, %v187_v58  ;;  %v294_v19 = vmax.f32 %v286_v9, %v290_v13  ;;  %v295_v20 = vmax.f32 %v287_v10, %v291_v14 }
 0x126   :  { %v347_v40 = vcombine.high %v339_v26, %v339_v26  ;;  %v355_v43 = vrot.slane %v339_v26, %v1017_v39  ;;  %v348_v45 = vcombine.high %v346_v27, %v346_v27  ;;  %v362_v50 = vrot.slane %v346_v27, %v1017_v39 }
 0x127   :  { %v296_v21 = vmax.f32 %v288_v15, %v292_v18  ;;  %v297_v22 = vmax.f32 %v293_v17, %v294_v19 }
 0x128   :  { %v369_v47 = vrot.slane %v347_v40, %v1017_v39  ;;  %v377_v51 = vcombine.high %v355_v43, %v355_v43  ;;  %v376_v52 = vrot.slane %v348_v45, %v1017_v39  ;;  %v384_v54 = vrot.slane %v355_v43, %v1020_v46 }
 0x129   :  { %v298_v24 = vmax.f32 %v295_v20, %v296_v21  ;;  %v378_v56 = vcombine.high %v362_v50, %v362_v50  ;;  %v400_v62 = vrot.slane %v362_v50, %v1020_v46 }
 0x12a   :  { %v379_v53 = vcombine.high %v369_v47, %v369_v47  ;;  %v388_v55 = vrot.slane %v369_v47, %v1020_v46  ;;  %v392_v57 = vrot.slane %v377_v51, %v1020_v46  ;;  %v380_v59 = vcombine.high %v376_v52, %v376_v52 }
 0x12b   :  { %v299_v25 = vmax.f32 %v297_v22, %v298_v24  ;;  %v404_v39 = vrot.slane %v376_v52, %v1020_v46  ;;  %v408_v4 = vrot.slane %v378_v56, %v1020_v46 }
 0x12c   :  { %v396_v60 = vrot.slane %v379_v53, %v1020_v46 }
 0x12d   :  { %v300_v28 = vsub.f32 %v285_v3, %v299_v25  ;;  %v301_v29 = vsub.f32 %v286_v9, %v299_v25  ;;  %v302_v30 = vsub.f32 %v287_v10, %v299_v25  ;;  %v303_v31 = vsub.f32 %v288_v15, %v299_v25 }
 0x12e   :  { %v304_v32 = vsub.f32 %v289_v11, %v299_v25  ;;  %v305_v33 = vsub.f32 %v290_v13, %v299_v25  ;;  %v306_v34 = vsub.f32 %v291_v14, %v299_v25  ;;  %v307_v35 = vsub.f32 %v292_v18, %v299_v25 }
 0x12f   :  { %v308_v36 = vmul.f32 1.442695, %v300_v28  ;;  %v310_v37 = vmul.f32 1.442695, %v301_v29  ;;  %v312_v38 = vmul.f32 1.442695, %v302_v30  ;;  %v412_v10 = vrot.slane %v380_v59, %v1020_v46 }
 0x130   :  { %v314_v41 = vmul.f32 1.442695, %v303_v31  ;;  %v316_v42 = vmul.f32 1.442695, %v304_v32  ;;  %v318_v44 = vmul.f32 1.442695, %v305_v33 }
 0x131   :  { %870 = vpow2.f32 %v308_v36  ;;  %v320_v48 = vmul.f32 1.442695, %v306_v34  ;;  %v322_v49 = vmul.f32 1.442695, %v307_v35  ;;  %v438_v30 = vld [vmem:[%s1138_s3] sm:$0xff] }
 0x132   :  { %872 = vpow2.f32 %v310_v37  ;;  %805 = vmatprep.subr.mxu1 %v438_v30 }
 0x133   :  { %874 = vpow2.f32 %v312_v38  ;;  %806 = vmatpush3.msra.mxu1 %v438_v30 }
 0x134   :  { %876 = vpow2.f32 %v314_v41 }
 0x135   :  { %878 = vpow2.f32 %v316_v42 }
 0x136   :  { %880 = vpow2.f32 %v318_v44 }
 0x137   :  { %882 = vpow2.f32 %v320_v48 }
 0x138   :  { %884 = vpow2.f32 %v322_v49  ;;  %v711_v49 = vld [vmem:[%s1139_s4] ss:$0 sm:$0xff] }
 0x13b   :  { %v871_v58 = vpop.eup %870 }
 0x13c   :  { %v873_v61 = vpop.eup %872  ;;  %v421_v63 = vmul.f32 %v871_v58, %v384_v54 }
 0x13d   :  { %v875_v0 = vpop.eup %874  ;;  %v422_v1 = vmul.f32 %v873_v61, %v388_v55  ;;  %v324_v2 = vadd.f32 %v873_v61, %v871_v58 }
 0x13e   :  { %v877_v3 = vpop.eup %876  ;;  %v423_v5 = vmul.f32 %v875_v0, %v392_v57 }
 0x13f   :  { %v879_v6 = vpop.eup %878  ;;  %v424_v7 = vmul.f32 %v877_v3, %v396_v60  ;;  %v429_v8 = vadd.f32 %v422_v1, %v421_v63  ;;  %v325_v9 = vadd.f32 %v875_v0, %v324_v2 }
 0x140   :  { %v881_v11 = vpop.eup %880  ;;  %v425_v12 = vmul.f32 %v879_v6, %v400_v62 }
 0x141   :  { %v883_v13 = vpop.eup %882  ;;  %v430_v14 = vadd.f32 %v429_v8, %v423_v5  ;;  %v326_v15 = vadd.f32 %v877_v3, %v325_v9  ;;  %v426_v16 = vmul.f32 %v881_v11, %v404_v39 }
 0x142   :  { %v885_v17 = vpop.eup %884  ;;  %v427_v18 = vmul.f32 %v883_v13, %v408_v4 }
 0x143   :  { %v327_v19 = vadd.f32 %v879_v6, %v326_v15  ;;  %v428_v20 = vmul.f32 %v885_v17, %v412_v10  ;;  %v431_v21 = vadd.f32 %v430_v14, %v424_v7 }
 0x145   :  { %v328_v22 = vadd.f32 %v881_v11, %v327_v19  ;;  %v432_v23 = vadd.f32 %v431_v21, %v425_v12 }
 0x147   :  { %v329_v24 = vadd.f32 %v883_v13, %v328_v22  ;;  %v433_v25 = vadd.f32 %v432_v23, %v426_v16 }
 0x149   :  { %v330_v26 = vadd.f32 %v885_v17, %v329_v24  ;;  %v434_v27 = vadd.f32 %v433_v25, %v427_v18 }
 0x14b   :  { %v435_v28 = vadd.f32 %v434_v27, %v428_v20  ;;  %886 = vrcp.f32 %v330_v26 }
 0x155   :  { %v887_v46 = vpop.eup %886 }
 0x156   :  { %v437_v29 = vmul.f32 %v887_v46, %v435_v28 }
 0x158   :  { %446 = vxpose.xlu1.b32.start.end [1/1] (short) %v437_v29, 128 }
 0x1d8   :  { %v462_v31 = vpop.trf.xlu1 }
 0x1d9   :  { %807 = vmatprep.mubr.msk.f32.mxu1 %vm478_vm3, %v462_v31 }
 0x1dc   :  { %v463_v32 = vpop.trf.xlu1 }
 0x1dd   :  { %808 = vmatmul.mubr.msk.f32.vlgmr.msra.gmra.mrb[0].mxu1 %vm478_vm3, %v463_v32 }
 0x1e0   :  { %v464_v33 = vpop.trf.xlu1 }
 0x1e1   :  { %810 = vmatprep.mubr.msk.f32.mxu1 %vm478_vm3, %v464_v33 }
 0x1e4   :  { %v465_v34 = vpop.trf.xlu1 }
 0x1e5   :  { %811 = vmatmul.mubr.msk.f32.gmra.mrb[2].mxu1 %vm478_vm3, %v465_v34 }
 0x1e8   :  { %v466_v35 = vpop.trf.xlu1 }
 0x1e9   :  { %813 = vmatprep.mubr.msk.f32.mxu1 %vm478_vm3, %v466_v35 }
 0x1ec   :  { %v467_v36 = vpop.trf.xlu1 }
 0x1ed   :  { %814 = vmatmul.mubr.msk.f32.gmra.mrb[4].mxu1 %vm478_vm3, %v467_v36 }
 0x1f0   :  { %v468_v37 = vpop.trf.xlu1 }
 0x1f1   :  { %816 = vmatprep.mubr.msk.f32.mxu1 %vm478_vm3, %v468_v37 }
 0x1f4   :  { %v469_v38 = vpop.trf.xlu1 }
 0x1f5   :  { %817 = vmatmul.mubr.msk.f32.gmra.mrb[6].mxu1 %vm478_vm3, %v469_v38 }
 0x1f8   :  { %v470_v40 = vpop.trf.xlu1 }
 0x1f9   :  { %819 = vmatprep.mubr.msk.f32.mxu1 %vm478_vm3, %v470_v40 }
 0x1fc   :  { %v471_v41 = vpop.trf.xlu1 }
 0x1fd   :  { %820 = vmatmul.mubr.msk.f32.gmra.mrb[8].mxu1 %vm478_vm3, %v471_v41 }
 0x200   :  { %v472_v42 = vpop.trf.xlu1 }
 0x201   :  { %822 = vmatprep.mubr.msk.f32.mxu1 %vm478_vm3, %v472_v42 }
 0x204   :  { %v473_v43 = vpop.trf.xlu1 }
 0x205   :  { %823 = vmatmul.mubr.msk.f32.gmra.mrb[10].mxu1 %vm478_vm3, %v473_v43 }
 0x208   :  { %v474_v44 = vpop.trf.xlu1 }
 0x209   :  { %825 = vmatprep.mubr.msk.f32.mxu1 %vm478_vm3, %v474_v44 }
 0x20c   :  { %v475_v45 = vpop.trf.xlu1 }
 0x20d   :  { %826 = vmatmul.mubr.msk.f32.gmra.mrb[12].mxu1 %vm478_vm3, %v475_v45 }
 0x210   :  { %v476_v47 = vpop.trf.xlu1 }
 0x211   :  { %828 = vmatprep.mubr.msk.f32.mxu1 %vm478_vm3, %v476_v47 }
 0x214   :  { %v477_v48 = vpop.trf.xlu1 }
 0x215   :  { %829 = vmatmul.mubr.msk.f32.gmra.mrb[14].mxu1 %vm478_vm3, %v477_v48 }
 0x2b0   :  { %v809_v50 = vpop.f32.mrb[0].mxu1 }
 0x2b1   :  { %v599_v51 = vadd.f32 %v809_v50, %v711_v49  ;;  %v593_v52 = vpop.f32.mrb[1].mxu1 }
 0x2b2   :  { %v594_v53 = vadd.f32 %v711_v49, %v593_v52 }
 0x2b3   :  { %673 = vst.msk [vmem:[%s1140_s5 + $0x8] sm:$0xff] %vm57_vm0, %v599_v51 }
 0x2b4   :  { %672 = vst.msk [vmem:[%s1140_s5] sm:$0xff] %vm57_vm0, %v594_v53 }
 0x2b8   :  { %v812_v54 = vpop.f32.mrb[2].mxu1 }
 0x2b9   :  { %v609_v55 = vadd.f32 %v812_v54, %v711_v49  ;;  %v603_v56 = vpop.f32.mrb[3].mxu1 }
 0x2ba   :  { %v604_v57 = vadd.f32 %v711_v49, %v603_v56 }
 0x2bb   :  { %675 = vst.msk [vmem:[%s1140_s5 + $0x18] sm:$0xff] %vm57_vm0, %v609_v55 }
 0x2bc   :  { %674 = vst.msk [vmem:[%s1140_s5 + $0x10] sm:$0xff] %vm57_vm0, %v604_v57 }
 0x2c0   :  { %v815_v58 = vpop.f32.mrb[4].mxu1 }
 0x2c1   :  { %v619_v59 = vadd.f32 %v815_v58, %v711_v49  ;;  %v613_v60 = vpop.f32.mrb[5].mxu1 }
 0x2c2   :  { %v614_v61 = vadd.f32 %v711_v49, %v613_v60 }
 0x2c3   :  { %677 = vst.msk [vmem:[%s1140_s5 + $0x28] sm:$0xff] %vm57_vm0, %v619_v59 }
 0x2c4   :  { %676 = vst.msk [vmem:[%s1140_s5 + $0x20] sm:$0xff] %vm57_vm0, %v614_v61 }
 0x2c8   :  { %v818_v62 = vpop.f32.mrb[6].mxu1 }
 0x2c9   :  { %v629_v63 = vadd.f32 %v818_v62, %v711_v49  ;;  %v623_v0 = vpop.f32.mrb[7].mxu1 }
 0x2ca   :  { %v624_v39 = vadd.f32 %v711_v49, %v623_v0 }
 0x2cb   :  { %679 = vst.msk [vmem:[%s1140_s5 + $0x38] sm:$0xff] %vm57_vm0, %v629_v63 }
 0x2cc   :  { %678 = vst.msk [vmem:[%s1140_s5 + $0x30] sm:$0xff] %vm57_vm0, %v624_v39 }
 0x2d0   :  { %v821_v1 = vpop.f32.mrb[8].mxu1 }
 0x2d1   :  { %v639_v2 = vadd.f32 %v821_v1, %v711_v49  ;;  %v633_v3 = vpop.f32.mrb[9].mxu1 }
 0x2d2   :  { %v634_v4 = vadd.f32 %v711_v49, %v633_v3 }
 0x2d3   :  { %681 = vst.msk [vmem:[%s1140_s5 + $0x48] sm:$0xff] %vm57_vm0, %v639_v2 }
 0x2d4   :  { %680 = vst.msk [vmem:[%s1140_s5 + $0x40] sm:$0xff] %vm57_vm0, %v634_v4 }
 0x2d8   :  { %v824_v5 = vpop.f32.mrb[10].mxu1 }
 0x2d9   :  { %v649_v6 = vadd.f32 %v824_v5, %v711_v49  ;;  %v643_v7 = vpop.f32.mrb[11].mxu1 }
 0x2da   :  { %v644_v8 = vadd.f32 %v711_v49, %v643_v7 }
 0x2db   :  { %683 = vst.msk [vmem:[%s1140_s5 + $0x58] sm:$0xff] %vm57_vm0, %v649_v6 }
 0x2dc   :  { %682 = vst.msk [vmem:[%s1140_s5 + $0x50] sm:$0xff] %vm57_vm0, %v644_v8 }
 0x2e0   :  { %v827_v9 = vpop.f32.mrb[12].mxu1 }
 0x2e1   :  { %v659_v10 = vadd.f32 %v827_v9, %v711_v49  ;;  %v653_v11 = vpop.f32.mrb[13].mxu1 }
 0x2e2   :  { %v654_v12 = vadd.f32 %v711_v49, %v653_v11 }
 0x2e3   :  { %685 = vst.msk [vmem:[%s1140_s5 + $0x68] sm:$0xff] %vm57_vm0, %v659_v10 }
 0x2e4   :  { %684 = vst.msk [vmem:[%s1140_s5 + $0x60] sm:$0xff] %vm57_vm0, %v654_v12 }
 0x2e8   :  { %v830_v13 = vpop.f32.mrb[14].mxu1 }
 0x2e9   :  { %v669_v14 = vadd.f32 %v830_v13, %v711_v49  ;;  %v663_v15 = vpop.f32.mrb[15].mxu1 }
 0x2ea   :  { %v664_v16 = vadd.f32 %v711_v49, %v663_v15 }
 0x2eb   :  { %687 = vst.msk [vmem:[%s1140_s5 + $0x78] sm:$0xff] %vm57_vm0, %v669_v14 }
 0x2ec   :  { %686 = vst.msk [vmem:[%s1140_s5 + $0x70] sm:$0xff] %vm57_vm0, %v664_v16 }

</bundles_post_ra>
